<compile_context>
chip_gen: v7x
topology: tpu7x:2x2x1
jax: 0.10.0
libtpu: 0.0.40
codegen_flags: <defaults>
</compile_context>

<pallas_src>
import jax
import jax.numpy as jnp
from jax.experimental import pallas as pl
from jax.experimental.pallas import tpu as pltpu


def _gru_seq_kernel(x_ref,        # (TB, H)  bf16  embedded tokens for this block
                    wih_hbm,      # (H, 3H)  bf16  W_ih^T, raw HBM ref (pl.ANY)
                    whh_hbm,      # (H, 3H)  bf16  W_hh^T, raw HBM ref (pl.ANY)
                    bih_ref,      # (1, 3H)  f32   b_ih, resident
                    bhh_ref,      # (1, 3H)  f32   b_hh, resident
                    h0_ref,       # (1, H)   f32   initial hidden, resident
                    out_ref,      # (TB, H)  f32   hidden state per step of block
                    wih_vmem,     # (H, 3H)  bf16  VMEM scratch (single-buffered weight)
                    whh_vmem,     # (H, 3H)  bf16  VMEM scratch (single-buffered weight)
                    dma_sem,      # (2,)     DMA semaphores for the one-time weight copy
                    gi_scr,       # (TB, 3H) f32   hoisted input-projection results
                    h_scr):       # (1, H)   f32   recurrent hidden state (persists)
    H = h0_ref.shape[-1]
    TB = x_ref.shape[0]
    blk = pl.program_id(0)

    # One-time setup on the first block: copy both weights into VMEM (single
    # copy each — no double-buffering) and load the initial hidden state.
    @pl.when(blk == 0)
    def _():
        cp_ih = pltpu.make_async_copy(wih_hbm, wih_vmem, dma_sem.at[0])
        cp_hh = pltpu.make_async_copy(whh_hbm, whh_vmem, dma_sem.at[1])
        cp_ih.start()
        cp_hh.start()
        cp_ih.wait()
        cp_hh.wait()
        h_scr[...] = h0_ref[...]

    # Phase 1 (non-recurrent): input projection for all TB steps of this block
    # in one MXU pass (M = TB rows instead of 1 per step).
    gi_scr[...] = (
        jnp.dot(x_ref[...], wih_vmem[...], preferred_element_type=jnp.float32)
        + bih_ref[...]
    )

    whh = whh_vmem[...]   # resident bf16 weight
    bhh = bhh_ref[...]

    # Phase 2 (recurrent): TB GRU steps, hidden state carried in f32.
    def step(i, h):
        gi = gi_scr[pl.ds(i, 1), :]                                   # (1, 3H) f32
        gh = jnp.dot(h.astype(whh.dtype), whh,
                     preferred_element_type=jnp.float32) + bhh        # (1, 3H) f32
        r = jax.nn.sigmoid(gi[:, 0:H] + gh[:, 0:H])
        z = jax.nn.sigmoid(gi[:, H:2 * H] + gh[:, H:2 * H])
        n = jnp.tanh(gi[:, 2 * H:3 * H] + r * gh[:, 2 * H:3 * H])
        h_new = (1.0 - z) * n + z * h                                 # f32 state
        out_ref[pl.ds(i, 1), :] = h_new.astype(out_ref.dtype)
        return h_new

    h_last = jax.lax.fori_loop(0, TB, step, h_scr[...], unroll=True)
    h_scr[...] = h_last


def encoder_rnn_encode(tokens, hidden0, params, *, steps_per_block=8):
    """Run the GRU encoder over a token sequence in a single pallas_call.

    tokens: (T,) int32, hidden0: (1, 1, H) f32.
    Returns (outputs (T, 1, H) f32, final hidden (1, 1, H) f32) — matching the
    per-step semantics of EncoderRNN.forward applied T times.
    """
    emb = params["embedding"]      # (vocab, H) bf16
    w_ih_t = params["w_ih_t"]      # (H, 3H)    bf16
    w_hh_t = params["w_hh_t"]      # (H, 3H)    bf16
    b_ih = params["b_ih"]          # (1, 3H)    f32
    b_hh = params["b_hh"]          # (1, 3H)    f32

    H = hidden0.shape[-1]
    H3 = 3 * H
    T = int(tokens.shape[0])
    TB = steps_per_block
    nb = pl.cdiv(T, TB)
    Tp = nb * TB

    tokens = jnp.asarray(tokens, jnp.int32).reshape(T)
    h0 = hidden0.reshape(1, H).astype(jnp.float32)

    # nn.Embedding lookup hoisted out of the recurrence (XLA gather), padded
    # to a whole number of TB-step blocks (padded rows are discarded).
    x_emb = jnp.take(emb, tokens, axis=0)                      # (T, H) bf16
    if Tp != T:
        pad = jnp.zeros((Tp - T, H), x_emb.dtype)
        x_emb = jnp.concatenate([x_emb, pad], axis=0)          # (Tp, H)

    # Explicit VMEM budget: single-buffered weights + double-buffered x/out
    # blocks + scratch, with headroom; clamped to stay within every chip's
    # physical VMEM. For very large H on v7x consider fp8 weights instead.
    w_bytes = 2 * (H * H3 * 2)                                  # w_ih_t + w_hh_t (bf16)
    io_bytes = 2 * (TB * H * 2) + 2 * (TB * H * 4)              # x (bf16) + out (f32), 2-buffered
    small_bytes = TB * H3 * 4 + H * 4 + 2 * (2 * H3 * 4 + H * 4)
    vmem_limit = int(min(64 * 2**20,
                         max(16 * 2**20, 4 * (w_bytes + io_bytes + small_bytes))))

    grid_spec = pltpu.PrefetchScalarGridSpec(
        num_scalar_prefetch=0,
        grid=(nb,),
        in_specs=[
            # Embedded tokens: one (TB, H) block per grid step, auto-pipelined.
            pl.BlockSpec((TB, H), lambda b: (b, 0)),
            # Weights: raw HBM refs, copied once into VMEM scratch (single copy).
            pl.BlockSpec(memory_space=pl.ANY),
            pl.BlockSpec(memory_space=pl.ANY),
            # Biases / h0: constant block index => fetched once, resident.
            pl.BlockSpec((1, H3), lambda b: (0, 0)),
            pl.BlockSpec((1, H3), lambda b: (0, 0)),
            pl.BlockSpec((1, H), lambda b: (0, 0)),
        ],
        out_specs=pl.BlockSpec((TB, H), lambda b: (b, 0)),
        scratch_shapes=[
            pltpu.VMEM((H, H3), w_ih_t.dtype),        # W_ih^T resident, single copy
            pltpu.VMEM((H, H3), w_hh_t.dtype),        # W_hh^T resident, single copy
            pltpu.SemaphoreType.DMA((2,)),            # one-time weight copies
            pltpu.VMEM((TB, H3), jnp.float32),        # hoisted input projection
            pltpu.VMEM((1, H), jnp.float32),          # recurrent hidden state
        ],
    )

    hs = pl.pallas_call(
        _gru_seq_kernel,
        grid_spec=grid_spec,
        out_shape=jax.ShapeDtypeStruct((Tp, H), jnp.float32),
        compiler_params=pltpu.CompilerParams(
            # Recurrence across blocks: must run sequentially on one core.
            dimension_semantics=("arbitrary",),
            vmem_limit_bytes=vmem_limit,
        ),
    )(x_emb, w_ih_t, w_hh_t, b_ih, b_hh, h0)

    outputs = hs[:T].reshape(T, 1, H)
    hidden_T = hs[T - 1].reshape(1, 1, H)
    return outputs, hidden_T


def encoder_rnn_forward(token_id, hidden, params):
    """Single-step API identical to EncoderRNN.forward: returns (output, hidden),
    both (1, 1, H); output == new hidden for a 1-layer GRU with seq_len=1."""
    tok = jnp.asarray(token_id, jnp.int32).reshape(1)
    outputs, hidden_new = encoder_rnn_encode(tok, hidden, params)
    out = outputs.reshape(1, 1, -1)
    return out, hidden_new


def init_params(vocab_size, hidden_size, key):
    """Synthetic parameters matching nn.Embedding + nn.GRU shapes.

    Returns (kernel_params, raw_f32_params). Kernel params hold transposed
    bf16 weights (H, 3H) and (1, 3H) f32 biases; raw params keep the
    PyTorch-layout f32 tensors for the reference implementation.
    """
    H = hidden_size
    k_emb, k_wih, k_whh, k_bih, k_bhh = jax.random.split(key, 5)
    bound = 1.0 / (H ** 0.5)

    emb = jax.random.normal(k_emb, (vocab_size, H), jnp.float32)
    # PyTorch stores weight_ih_l0 / weight_hh_l0 as (3H, H), gate order [r,z,n].
    w_ih = jax.random.uniform(k_wih, (3 * H, H), jnp.float32, -bound, bound)
    w_hh = jax.random.uniform(k_whh, (3 * H, H), jnp.float32, -bound, bound)
    b_ih = jax.random.uniform(k_bih, (3 * H,), jnp.float32, -bound, bound)
    b_hh = jax.random.uniform(k_bhh, (3 * H,), jnp.float32, -bound, bound)

    params = {
        "embedding": emb.astype(jnp.bfloat16),
        "w_ih_t": w_ih.T.astype(jnp.bfloat16),    # (H, 3H)
        "w_hh_t": w_hh.T.astype(jnp.bfloat16),    # (H, 3H)
        "b_ih": b_ih.reshape(1, 3 * H),
        "b_hh": b_hh.reshape(1, 3 * H),
    }
    raw = {"embedding": emb, "w_ih": w_ih, "w_hh": w_hh, "b_ih": b_ih, "b_hh": b_hh}
    return params, raw


def _reference_encode_mirrored(tokens, hidden0, params):
    """Pure-JAX reference mirroring the kernel's dtype handling exactly
    (bf16 matmul operands, f32 accumulation / gate math / recurrent state,
    hoisted input projection)."""
    H = hidden0.shape[-1]
    toks = jnp.asarray(tokens, jnp.int32)
    x = jnp.take(params["embedding"], toks, axis=0)                      # (T, H) bf16
    gi_all = jnp.dot(x, params["w_ih_t"],
                     preferred_element_type=jnp.float32) + params["b_ih"]
    h = hidden0.reshape(1, H).astype(jnp.float32)
    outs = []
    for t in range(int(tokens.shape[0])):
        gi = gi_all[t:t + 1]
        gh = jnp.dot(h.astype(jnp.bfloat16), params["w_hh_t"],
                     preferred_element_type=jnp.float32) + params["b_hh"]
        r = jax.nn.sigmoid(gi[:, :H] + gh[:, :H])
        z = jax.nn.sigmoid(gi[:, H:2 * H] + gh[:, H:2 * H])
        n = jnp.tanh(gi[:, 2 * H:] + r * gh[:, 2 * H:])
        h = (1.0 - z) * n + z * h
        outs.append(h)
    return jnp.stack(outs).reshape(-1, 1, H), h.reshape(1, 1, H)


def _reference_encode_f32(tokens, hidden0, raw):
    """Full-f32 mirror of nn.Embedding + nn.GRU (PyTorch formula, gate order r,z,n)."""
    H = hidden0.shape[-1]
    h = hidden0.reshape(1, H)
    outs = []
    for t in range(int(tokens.shape[0])):
        x = raw["embedding"][tokens[t]].reshape(1, H)
        gi = x @ raw["w_ih"].T + raw["b_ih"]
        gh = h @ raw["w_hh"].T + raw["b_hh"]
        r = jax.nn.sigmoid(gi[:, :H] + gh[:, :H])
        z = jax.nn.sigmoid(gi[:, H:2 * H] + gh[:, H:2 * H])
        n = jnp.tanh(gi[:, 2 * H:] + r * gh[:, 2 * H:])
        h = (1.0 - z) * n + z * h
        outs.append(h)
    return jnp.stack(outs).reshape(-1, 1, H), h.reshape(1, 1, H)


if __name__ == "__main__":
    vocab_size = 10
    hidden_size = 32
    seq_len = 8

    key = jax.random.PRNGKey(0)
    k_params, k_tok = jax.random.split(key)

    params, raw = init_params(vocab_size, hidden_size, k_params)
    tokens = jax.random.randint(k_tok, (seq_len,), 0, vocab_size, jnp.int32)
    hidden0 = jnp.zeros((1, 1, hidden_size), jnp.float32)   # EncoderRNN.initHidden()

    # Whole sequence in one kernel launch (8 timesteps per grid step).
    outputs, hidden_T = encoder_rnn_encode(tokens, hidden0, params)
    outputs = jax.block_until_ready(outputs)
    hidden_T = jax.block_until_ready(hidden_T)
    assert outputs.shape == (seq_len, 1, hidden_size)
    assert hidden_T.shape == (1, 1, hidden_size)

    # Check against a pure-JAX reference with identical dtype handling.
    ref_out, ref_h = _reference_encode_mirrored(tokens, hidden0, params)
    assert jnp.allclose(outputs, ref_out, atol=1e-3, rtol=1e-3)
    assert jnp.allclose(hidden_T, ref_h, atol=1e-3, rtol=1e-3)

    # Check GRU semantics against a full-f32 PyTorch-formula reference
    # (looser tolerance: weights are intentionally bf16 in the kernel).
    ref_out_f32, ref_h_f32 = _reference_encode_f32(tokens, hidden0, raw)
    assert jnp.allclose(outputs, ref_out_f32, atol=5e-2)
    assert jnp.allclose(hidden_T, ref_h_f32, atol=5e-2)

    # Single-step API (identical to EncoderRNN.forward) matches step 0.
    out1, h1 = encoder_rnn_forward(tokens[0], hidden0, params)
    out1 = jax.block_until_ready(out1)
    assert out1.shape == (1, 1, hidden_size) and h1.shape == (1, 1, hidden_size)
    assert jnp.allclose(out1, outputs[0].reshape(1, 1, -1), atol=1e-5)
    assert jnp.allclose(out1, h1)

    print("KERNEL_OK")
</pallas_src>

<mosaic_0001>
module attributes {stable_mosaic.version = 11 : i64} {
  func.func @_gru_seq_kernel(%arg0: i32, %arg1: memref<8x32xbf16, #tpu.memory_space<vmem>>, %arg2: memref<32x96xbf16, #tpu.memory_space<any>>, %arg3: memref<32x96xbf16, #tpu.memory_space<any>>, %arg4: memref<1x96xf32, #tpu.memory_space<vmem>>, %arg5: memref<1x96xf32, #tpu.memory_space<vmem>>, %arg6: memref<1x32xf32, #tpu.memory_space<vmem>>, %arg7: memref<8x32xf32, #tpu.memory_space<vmem>>, %arg8: memref<32x96xbf16, #tpu.memory_space<vmem>>, %arg9: memref<32x96xbf16, #tpu.memory_space<vmem>>, %arg10: memref<2x!tpu.dma_semaphore, #tpu.memory_space<semaphore_mem>>, %arg11: memref<8x96xf32, #tpu.memory_space<vmem>>, %arg12: memref<1x32xf32, #tpu.memory_space<vmem>>) attributes {dimension_semantics = [#tpu.dimension_semantics<arbitrary>], iteration_bounds = array<i64: 1>, scalar_prefetch = 0 : i64, scratch_operands = 5 : i64, tpu.core_type = #tpu.core_type<tc>, window_params = [{transform_indices = @transform_0, window_bounds = array<i64: 8, 32>}, {}, {}, {pipeline_mode = #tpu.pipeline_mode<synchronous>, transform_indices = @transform_3, window_bounds = array<i64: 1, 96>}, {pipeline_mode = #tpu.pipeline_mode<synchronous>, transform_indices = @transform_4, window_bounds = array<i64: 1, 96>}, {pipeline_mode = #tpu.pipeline_mode<synchronous>, transform_indices = @transform_5, window_bounds = array<i64: 1, 32>}, {transform_indices = @transform_6, window_bounds = array<i64: 8, 32>}]} {
    %c0_i32 = arith.constant 0 : i32
    %0 = arith.cmpi eq, %arg0, %c0_i32 : i32
    %1 = arith.extui %0 : i1 to i32
    %c0_i32_0 = arith.constant 0 : i32
    %2 = arith.cmpi ne, %1, %c0_i32_0 : i32
    scf.if %2 {
      %c0_i32_65 = arith.constant 0 : i32
      %278 = tpu.memref_slice %arg10[%c0_i32_65] : memref<2x!tpu.dma_semaphore, #tpu.memory_space<semaphore_mem>> -> memref<1x!tpu.dma_semaphore, #tpu.memory_space<semaphore_mem>>
      %279 = tpu.memref_squeeze %278 : memref<1x!tpu.dma_semaphore, #tpu.memory_space<semaphore_mem>> -> memref<!tpu.dma_semaphore, #tpu.memory_space<semaphore_mem>>
      tpu.enqueue_dma source(%arg2 : memref<32x96xbf16, #tpu.memory_space<any>>) target(%arg8 : memref<32x96xbf16, #tpu.memory_space<vmem>>) target_semaphore(%279 : memref<!tpu.dma_semaphore, #tpu.memory_space<semaphore_mem>>)
      %c1_i32_66 = arith.constant 1 : i32
      %280 = tpu.memref_slice %arg10[%c1_i32_66] : memref<2x!tpu.dma_semaphore, #tpu.memory_space<semaphore_mem>> -> memref<1x!tpu.dma_semaphore, #tpu.memory_space<semaphore_mem>>
      %281 = tpu.memref_squeeze %280 : memref<1x!tpu.dma_semaphore, #tpu.memory_space<semaphore_mem>> -> memref<!tpu.dma_semaphore, #tpu.memory_space<semaphore_mem>>
      tpu.enqueue_dma source(%arg3 : memref<32x96xbf16, #tpu.memory_space<any>>) target(%arg9 : memref<32x96xbf16, #tpu.memory_space<vmem>>) target_semaphore(%281 : memref<!tpu.dma_semaphore, #tpu.memory_space<semaphore_mem>>)
      %c0_i32_67 = arith.constant 0 : i32
      %282 = tpu.memref_slice %arg10[%c0_i32_67] : memref<2x!tpu.dma_semaphore, #tpu.memory_space<semaphore_mem>> -> memref<1x!tpu.dma_semaphore, #tpu.memory_space<semaphore_mem>>
      %283 = tpu.memref_squeeze %282 : memref<1x!tpu.dma_semaphore, #tpu.memory_space<semaphore_mem>> -> memref<!tpu.dma_semaphore, #tpu.memory_space<semaphore_mem>>
      tpu.wait_dma2 semaphore(%283 : memref<!tpu.dma_semaphore, #tpu.memory_space<semaphore_mem>>) src(%arg2 : memref<32x96xbf16, #tpu.memory_space<any>>) dst(%arg8 : memref<32x96xbf16, #tpu.memory_space<vmem>>)
      %c1_i32_68 = arith.constant 1 : i32
      %284 = tpu.memref_slice %arg10[%c1_i32_68] : memref<2x!tpu.dma_semaphore, #tpu.memory_space<semaphore_mem>> -> memref<1x!tpu.dma_semaphore, #tpu.memory_space<semaphore_mem>>
      %285 = tpu.memref_squeeze %284 : memref<1x!tpu.dma_semaphore, #tpu.memory_space<semaphore_mem>> -> memref<!tpu.dma_semaphore, #tpu.memory_space<semaphore_mem>>
      tpu.wait_dma2 semaphore(%285 : memref<!tpu.dma_semaphore, #tpu.memory_space<semaphore_mem>>) src(%arg3 : memref<32x96xbf16, #tpu.memory_space<any>>) dst(%arg9 : memref<32x96xbf16, #tpu.memory_space<vmem>>)
      %c0_69 = arith.constant 0 : index
      %c0_70 = arith.constant 0 : index
      %286 = vector.load %arg6[%c0_69, %c0_70] : memref<1x32xf32, #tpu.memory_space<vmem>>, vector<1x32xf32>
      %c0_71 = arith.constant 0 : index
      %c0_72 = arith.constant 0 : index
      %287 = vector.load %arg12[%c0_71, %c0_72] : memref<1x32xf32, #tpu.memory_space<vmem>>, vector<1x32xf32>
      tpu.vector_store %arg12[%c0_71, %c0_72], %286 {strides = array<i32>} : memref<1x32xf32, #tpu.memory_space<vmem>>, vector<1x32xf32>,
    } else {
    }
    %c0 = arith.constant 0 : index
    %c0_1 = arith.constant 0 : index
    %3 = vector.load %arg1[%c0, %c0_1] : memref<8x32xbf16, #tpu.memory_space<vmem>>, vector<8x32xbf16>
    %c0_2 = arith.constant 0 : index
    %c0_3 = arith.constant 0 : index
    %4 = vector.load %arg8[%c0_2, %c0_3] : memref<32x96xbf16, #tpu.memory_space<vmem>>, vector<32x96xbf16>
    %cst = arith.constant dense<0.000000e+00> : vector<8x96xf32>
    %5 = tpu.matmul %3, %4, %cst {dimension_numbers = #tpu.dot_dimension_numbers<[1], [0], [0], [1], [0, 0, 1, 1], [], []>} : vector<8x32xbf16>, vector<32x96xbf16>, vector<8x96xf32> -> vector<8x96xf32>
    %c0_4 = arith.constant 0 : index
    %c0_5 = arith.constant 0 : index
    %6 = vector.load %arg4[%c0_4, %c0_5] : memref<1x96xf32, #tpu.memory_space<vmem>>, vector<1x96xf32>
    %7 = vector.broadcast %6 : vector<1x96xf32> to vector<8x96xf32>
    %8 = arith.addf %5, %7 : vector<8x96xf32>
    %c0_6 = arith.constant 0 : index
    %c0_7 = arith.constant 0 : index
    %9 = vector.load %arg11[%c0_6, %c0_7] : memref<8x96xf32, #tpu.memory_space<vmem>>, vector<8x96xf32>
    tpu.vector_store %arg11[%c0_6, %c0_7], %8 {strides = array<i32>} : memref<8x96xf32, #tpu.memory_space<vmem>>, vector<8x96xf32>,
    %c0_8 = arith.constant 0 : index
    %c0_9 = arith.constant 0 : index
    %10 = vector.load %arg9[%c0_8, %c0_9] : memref<32x96xbf16, #tpu.memory_space<vmem>>, vector<32x96xbf16>
    %c0_10 = arith.constant 0 : index
    %c0_11 = arith.constant 0 : index
    %11 = vector.load %arg5[%c0_10, %c0_11] : memref<1x96xf32, #tpu.memory_space<vmem>>, vector<1x96xf32>
    %c0_12 = arith.constant 0 : index
    %c0_13 = arith.constant 0 : index
    %12 = vector.load %arg12[%c0_12, %c0_13] : memref<1x32xf32, #tpu.memory_space<vmem>>, vector<1x32xf32>
    %c0_i32_14 = arith.constant 0 : i32
    %13 = arith.index_cast %c0_i32_14 : i32 to index
    %c0_15 = arith.constant 0 : index
    %14 = vector.load %arg11[%13, %c0_15] : memref<8x96xf32, #tpu.memory_space<vmem>>, vector<1x96xf32>
    %15 = arith.truncf %12 : vector<1x32xf32> to vector<1x32xbf16>
    %cst_16 = arith.constant dense<0.000000e+00> : vector<1x96xf32>
    %16 = tpu.matmul %15, %10, %cst_16 {dimension_numbers = #tpu.dot_dimension_numbers<[1], [0], [0], [1], [0, 0, 1, 1], [], []>} : vector<1x32xbf16>, vector<32x96xbf16>, vector<1x96xf32> -> vector<1x96xf32>
    %17 = arith.addf %16, %11 : vector<1x96xf32>
    %18 = vector.extract_strided_slice %14 {offsets = [0, 0], sizes = [1, 32], strides = [1, 1]} : vector<1x96xf32> to vector<1x32xf32>
    %19 = vector.extract_strided_slice %17 {offsets = [0, 0], sizes = [1, 32], strides = [1, 1]} : vector<1x96xf32> to vector<1x32xf32>
    %20 = arith.addf %18, %19 : vector<1x32xf32>
    %21 = arith.negf %20 : vector<1x32xf32>
    %22 = math.exp %21 : vector<1x32xf32>
    %cst_17 = arith.constant 1.000000e+00 : f32
    %23 = vector.broadcast %cst_17 : f32 to vector<1x32xf32>
    %24 = arith.addf %23, %22 : vector<1x32xf32>
    %25 = arith.divf %23, %24 : vector<1x32xf32>
    %26 = vector.extract_strided_slice %14 {offsets = [0, 32], sizes = [1, 32], strides = [1, 1]} : vector<1x96xf32> to vector<1x32xf32>
    %27 = vector.extract_strided_slice %17 {offsets = [0, 32], sizes = [1, 32], strides = [1, 1]} : vector<1x96xf32> to vector<1x32xf32>
    %28 = arith.addf %26, %27 : vector<1x32xf32>
    %29 = arith.negf %28 : vector<1x32xf32>
    %30 = math.exp %29 : vector<1x32xf32>
    %cst_18 = arith.constant 1.000000e+00 : f32
    %31 = vector.broadcast %cst_18 : f32 to vector<1x32xf32>
    %32 = arith.addf %31, %30 : vector<1x32xf32>
    %33 = arith.divf %31, %32 : vector<1x32xf32>
    %34 = vector.extract_strided_slice %14 {offsets = [0, 64], sizes = [1, 32], strides = [1, 1]} : vector<1x96xf32> to vector<1x32xf32>
    %35 = vector.extract_strided_slice %17 {offsets = [0, 64], sizes = [1, 32], strides = [1, 1]} : vector<1x96xf32> to vector<1x32xf32>
    %36 = arith.mulf %25, %35 : vector<1x32xf32>
    %37 = arith.addf %34, %36 : vector<1x32xf32>
    %38 = math.tanh %37 : vector<1x32xf32>
    %cst_19 = arith.constant 1.000000e+00 : f32
    %39 = vector.broadcast %cst_19 : f32 to vector<1x32xf32>
    %40 = arith.subf %39, %33 : vector<1x32xf32>
    %41 = arith.mulf %40, %38 : vector<1x32xf32>
    %42 = arith.mulf %33, %12 : vector<1x32xf32>
    %43 = arith.addf %41, %42 : vector<1x32xf32>
    %44 = arith.index_cast %c0_i32_14 : i32 to index
    %c0_20 = arith.constant 0 : index
    %45 = vector.load %arg7[%44, %c0_20] : memref<8x32xf32, #tpu.memory_space<vmem>>, vector<1x32xf32>
    tpu.vector_store %arg7[%44, %c0_20], %43 {strides = array<i32>} : memref<8x32xf32, #tpu.memory_space<vmem>>, vector<1x32xf32>,
    %c1_i32 = arith.constant 1 : i32
    %46 = arith.index_cast %c1_i32 : i32 to index
    %c0_21 = arith.constant 0 : index
    %47 = vector.load %arg11[%46, %c0_21] : memref<8x96xf32, #tpu.memory_space<vmem>>, vector<1x96xf32>
    %48 = arith.truncf %43 : vector<1x32xf32> to vector<1x32xbf16>
    %cst_22 = arith.constant dense<0.000000e+00> : vector<1x96xf32>
    %49 = tpu.matmul %48, %10, %cst_22 {dimension_numbers = #tpu.dot_dimension_numbers<[1], [0], [0], [1], [0, 0, 1, 1], [], []>} : vector<1x32xbf16>, vector<32x96xbf16>, vector<1x96xf32> -> vector<1x96xf32>
    %50 = arith.addf %49, %11 : vector<1x96xf32>
    %51 = vector.extract_strided_slice %47 {offsets = [0, 0], sizes = [1, 32], strides = [1, 1]} : vector<1x96xf32> to vector<1x32xf32>
    %52 = vector.extract_strided_slice %50 {offsets = [0, 0], sizes = [1, 32], strides = [1, 1]} : vector<1x96xf32> to vector<1x32xf32>
    %53 = arith.addf %51, %52 : vector<1x32xf32>
    %54 = arith.negf %53 : vector<1x32xf32>
    %55 = math.exp %54 : vector<1x32xf32>
    %cst_23 = arith.constant 1.000000e+00 : f32
    %56 = vector.broadcast %cst_23 : f32 to vector<1x32xf32>
    %57 = arith.addf %56, %55 : vector<1x32xf32>
    %58 = arith.divf %56, %57 : vector<1x32xf32>
    %59 = vector.extract_strided_slice %47 {offsets = [0, 32], sizes = [1, 32], strides = [1, 1]} : vector<1x96xf32> to vector<1x32xf32>
    %60 = vector.extract_strided_slice %50 {offsets = [0, 32], sizes = [1, 32], strides = [1, 1]} : vector<1x96xf32> to vector<1x32xf32>
    %61 = arith.addf %59, %60 : vector<1x32xf32>
    %62 = arith.negf %61 : vector<1x32xf32>
    %63 = math.exp %62 : vector<1x32xf32>
    %cst_24 = arith.constant 1.000000e+00 : f32
    %64 = vector.broadcast %cst_24 : f32 to vector<1x32xf32>
    %65 = arith.addf %64, %63 : vector<1x32xf32>
    %66 = arith.divf %64, %65 : vector<1x32xf32>
    %67 = vector.extract_strided_slice %47 {offsets = [0, 64], sizes = [1, 32], strides = [1, 1]} : vector<1x96xf32> to vector<1x32xf32>
    %68 = vector.extract_strided_slice %50 {offsets = [0, 64], sizes = [1, 32], strides = [1, 1]} : vector<1x96xf32> to vector<1x32xf32>
    %69 = arith.mulf %58, %68 : vector<1x32xf32>
    %70 = arith.addf %67, %69 : vector<1x32xf32>
    %71 = math.tanh %70 : vector<1x32xf32>
    %cst_25 = arith.constant 1.000000e+00 : f32
    %72 = vector.broadcast %cst_25 : f32 to vector<1x32xf32>
    %73 = arith.subf %72, %66 : vector<1x32xf32>
    %74 = arith.mulf %73, %71 : vector<1x32xf32>
    %75 = arith.mulf %66, %43 : vector<1x32xf32>
    %76 = arith.addf %74, %75 : vector<1x32xf32>
    %77 = arith.index_cast %c1_i32 : i32 to index
    %c0_26 = arith.constant 0 : index
    %78 = vector.load %arg7[%77, %c0_26] : memref<8x32xf32, #tpu.memory_space<vmem>>, vector<1x32xf32>
    tpu.vector_store %arg7[%77, %c0_26], %76 {strides = array<i32>} : memref<8x32xf32, #tpu.memory_space<vmem>>, vector<1x32xf32>,
    %c2_i32 = arith.constant 2 : i32
    %79 = arith.index_cast %c2_i32 : i32 to index
    %c0_27 = arith.constant 0 : index
    %80 = vector.load %arg11[%79, %c0_27] : memref<8x96xf32, #tpu.memory_space<vmem>>, vector<1x96xf32>
    %81 = arith.truncf %76 : vector<1x32xf32> to vector<1x32xbf16>
    %cst_28 = arith.constant dense<0.000000e+00> : vector<1x96xf32>
    %82 = tpu.matmul %81, %10, %cst_28 {dimension_numbers = #tpu.dot_dimension_numbers<[1], [0], [0], [1], [0, 0, 1, 1], [], []>} : vector<1x32xbf16>, vector<32x96xbf16>, vector<1x96xf32> -> vector<1x96xf32>
    %83 = arith.addf %82, %11 : vector<1x96xf32>
    %84 = vector.extract_strided_slice %80 {offsets = [0, 0], sizes = [1, 32], strides = [1, 1]} : vector<1x96xf32> to vector<1x32xf32>
    %85 = vector.extract_strided_slice %83 {offsets = [0, 0], sizes = [1, 32], strides = [1, 1]} : vector<1x96xf32> to vector<1x32xf32>
    %86 = arith.addf %84, %85 : vector<1x32xf32>
    %87 = arith.negf %86 : vector<1x32xf32>
    %88 = math.exp %87 : vector<1x32xf32>
    %cst_29 = arith.constant 1.000000e+00 : f32
    %89 = vector.broadcast %cst_29 : f32 to vector<1x32xf32>
    %90 = arith.addf %89, %88 : vector<1x32xf32>
    %91 = arith.divf %89, %90 : vector<1x32xf32>
    %92 = vector.extract_strided_slice %80 {offsets = [0, 32], sizes = [1, 32], strides = [1, 1]} : vector<1x96xf32> to vector<1x32xf32>
    %93 = vector.extract_strided_slice %83 {offsets = [0, 32], sizes = [1, 32], strides = [1, 1]} : vector<1x96xf32> to vector<1x32xf32>
    %94 = arith.addf %92, %93 : vector<1x32xf32>
    %95 = arith.negf %94 : vector<1x32xf32>
    %96 = math.exp %95 : vector<1x32xf32>
    %cst_30 = arith.constant 1.000000e+00 : f32
    %97 = vector.broadcast %cst_30 : f32 to vector<1x32xf32>
    %98 = arith.addf %97, %96 : vector<1x32xf32>
    %99 = arith.divf %97, %98 : vector<1x32xf32>
    %100 = vector.extract_strided_slice %80 {offsets = [0, 64], sizes = [1, 32], strides = [1, 1]} : vector<1x96xf32> to vector<1x32xf32>
    %101 = vector.extract_strided_slice %83 {offsets = [0, 64], sizes = [1, 32], strides = [1, 1]} : vector<1x96xf32> to vector<1x32xf32>
    %102 = arith.mulf %91, %101 : vector<1x32xf32>
    %103 = arith.addf %100, %102 : vector<1x32xf32>
    %104 = math.tanh %103 : vector<1x32xf32>
    %cst_31 = arith.constant 1.000000e+00 : f32
    %105 = vector.broadcast %cst_31 : f32 to vector<1x32xf32>
    %106 = arith.subf %105, %99 : vector<1x32xf32>
    %107 = arith.mulf %106, %104 : vector<1x32xf32>
    %108 = arith.mulf %99, %76 : vector<1x32xf32>
    %109 = arith.addf %107, %108 : vector<1x32xf32>
    %110 = arith.index_cast %c2_i32 : i32 to index
    %c0_32 = arith.constant 0 : index
    %111 = vector.load %arg7[%110, %c0_32] : memref<8x32xf32, #tpu.memory_space<vmem>>, vector<1x32xf32>
    tpu.vector_store %arg7[%110, %c0_32], %109 {strides = array<i32>} : memref<8x32xf32, #tpu.memory_space<vmem>>, vector<1x32xf32>,
    %c3_i32 = arith.constant 3 : i32
    %112 = arith.index_cast %c3_i32 : i32 to index
    %c0_33 = arith.constant 0 : index
    %113 = vector.load %arg11[%112, %c0_33] : memref<8x96xf32, #tpu.memory_space<vmem>>, vector<1x96xf32>
    %114 = arith.truncf %109 : vector<1x32xf32> to vector<1x32xbf16>
    %cst_34 = arith.constant dense<0.000000e+00> : vector<1x96xf32>
    %115 = tpu.matmul %114, %10, %cst_34 {dimension_numbers = #tpu.dot_dimension_numbers<[1], [0], [0], [1], [0, 0, 1, 1], [], []>} : vector<1x32xbf16>, vector<32x96xbf16>, vector<1x96xf32> -> vector<1x96xf32>
    %116 = arith.addf %115, %11 : vector<1x96xf32>
    %117 = vector.extract_strided_slice %113 {offsets = [0, 0], sizes = [1, 32], strides = [1, 1]} : vector<1x96xf32> to vector<1x32xf32>
    %118 = vector.extract_strided_slice %116 {offsets = [0, 0], sizes = [1, 32], strides = [1, 1]} : vector<1x96xf32> to vector<1x32xf32>
    %119 = arith.addf %117, %118 : vector<1x32xf32>
    %120 = arith.negf %119 : vector<1x32xf32>
    %121 = math.exp %120 : vector<1x32xf32>
    %cst_35 = arith.constant 1.000000e+00 : f32
    %122 = vector.broadcast %cst_35 : f32 to vector<1x32xf32>
    %123 = arith.addf %122, %121 : vector<1x32xf32>
    %124 = arith.divf %122, %123 : vector<1x32xf32>
    %125 = vector.extract_strided_slice %113 {offsets = [0, 32], sizes = [1, 32], strides = [1, 1]} : vector<1x96xf32> to vector<1x32xf32>
    %126 = vector.extract_strided_slice %116 {offsets = [0, 32], sizes = [1, 32], strides = [1, 1]} : vector<1x96xf32> to vector<1x32xf32>
    %127 = arith.addf %125, %126 : vector<1x32xf32>
    %128 = arith.negf %127 : vector<1x32xf32>
    %129 = math.exp %128 : vector<1x32xf32>
    %cst_36 = arith.constant 1.000000e+00 : f32
    %130 = vector.broadcast %cst_36 : f32 to vector<1x32xf32>
    %131 = arith.addf %130, %129 : vector<1x32xf32>
    %132 = arith.divf %130, %131 : vector<1x32xf32>
    %133 = vector.extract_strided_slice %113 {offsets = [0, 64], sizes = [1, 32], strides = [1, 1]} : vector<1x96xf32> to vector<1x32xf32>
    %134 = vector.extract_strided_slice %116 {offsets = [0, 64], sizes = [1, 32], strides = [1, 1]} : vector<1x96xf32> to vector<1x32xf32>
    %135 = arith.mulf %124, %134 : vector<1x32xf32>
    %136 = arith.addf %133, %135 : vector<1x32xf32>
    %137 = math.tanh %136 : vector<1x32xf32>
    %cst_37 = arith.constant 1.000000e+00 : f32
    %138 = vector.broadcast %cst_37 : f32 to vector<1x32xf32>
    %139 = arith.subf %138, %132 : vector<1x32xf32>
    %140 = arith.mulf %139, %137 : vector<1x32xf32>
    %141 = arith.mulf %132, %109 : vector<1x32xf32>
    %142 = arith.addf %140, %141 : vector<1x32xf32>
    %143 = arith.index_cast %c3_i32 : i32 to index
    %c0_38 = arith.constant 0 : index
    %144 = vector.load %arg7[%143, %c0_38] : memref<8x32xf32, #tpu.memory_space<vmem>>, vector<1x32xf32>
    tpu.vector_store %arg7[%143, %c0_38], %142 {strides = array<i32>} : memref<8x32xf32, #tpu.memory_space<vmem>>, vector<1x32xf32>,
    %c4_i32 = arith.constant 4 : i32
    %145 = arith.index_cast %c4_i32 : i32 to index
    %c0_39 = arith.constant 0 : index
    %146 = vector.load %arg11[%145, %c0_39] : memref<8x96xf32, #tpu.memory_space<vmem>>, vector<1x96xf32>
    %147 = arith.truncf %142 : vector<1x32xf32> to vector<1x32xbf16>
    %cst_40 = arith.constant dense<0.000000e+00> : vector<1x96xf32>
    %148 = tpu.matmul %147, %10, %cst_40 {dimension_numbers = #tpu.dot_dimension_numbers<[1], [0], [0], [1], [0, 0, 1, 1], [], []>} : vector<1x32xbf16>, vector<32x96xbf16>, vector<1x96xf32> -> vector<1x96xf32>
    %149 = arith.addf %148, %11 : vector<1x96xf32>
    %150 = vector.extract_strided_slice %146 {offsets = [0, 0], sizes = [1, 32], strides = [1, 1]} : vector<1x96xf32> to vector<1x32xf32>
    %151 = vector.extract_strided_slice %149 {offsets = [0, 0], sizes = [1, 32], strides = [1, 1]} : vector<1x96xf32> to vector<1x32xf32>
    %152 = arith.addf %150, %151 : vector<1x32xf32>
    %153 = arith.negf %152 : vector<1x32xf32>
    %154 = math.exp %153 : vector<1x32xf32>
    %cst_41 = arith.constant 1.000000e+00 : f32
    %155 = vector.broadcast %cst_41 : f32 to vector<1x32xf32>
    %156 = arith.addf %155, %154 : vector<1x32xf32>
    %157 = arith.divf %155, %156 : vector<1x32xf32>
    %158 = vector.extract_strided_slice %146 {offsets = [0, 32], sizes = [1, 32], strides = [1, 1]} : vector<1x96xf32> to vector<1x32xf32>
    %159 = vector.extract_strided_slice %149 {offsets = [0, 32], sizes = [1, 32], strides = [1, 1]} : vector<1x96xf32> to vector<1x32xf32>
    %160 = arith.addf %158, %159 : vector<1x32xf32>
    %161 = arith.negf %160 : vector<1x32xf32>
    %162 = math.exp %161 : vector<1x32xf32>
    %cst_42 = arith.constant 1.000000e+00 : f32
    %163 = vector.broadcast %cst_42 : f32 to vector<1x32xf32>
    %164 = arith.addf %163, %162 : vector<1x32xf32>
    %165 = arith.divf %163, %164 : vector<1x32xf32>
    %166 = vector.extract_strided_slice %146 {offsets = [0, 64], sizes = [1, 32], strides = [1, 1]} : vector<1x96xf32> to vector<1x32xf32>
    %167 = vector.extract_strided_slice %149 {offsets = [0, 64], sizes = [1, 32], strides = [1, 1]} : vector<1x96xf32> to vector<1x32xf32>
    %168 = arith.mulf %157, %167 : vector<1x32xf32>
    %169 = arith.addf %166, %168 : vector<1x32xf32>
    %170 = math.tanh %169 : vector<1x32xf32>
    %cst_43 = arith.constant 1.000000e+00 : f32
    %171 = vector.broadcast %cst_43 : f32 to vector<1x32xf32>
    %172 = arith.subf %171, %165 : vector<1x32xf32>
    %173 = arith.mulf %172, %170 : vector<1x32xf32>
    %174 = arith.mulf %165, %142 : vector<1x32xf32>
    %175 = arith.addf %173, %174 : vector<1x32xf32>
    %176 = arith.index_cast %c4_i32 : i32 to index
    %c0_44 = arith.constant 0 : index
    %177 = vector.load %arg7[%176, %c0_44] : memref<8x32xf32, #tpu.memory_space<vmem>>, vector<1x32xf32>
    tpu.vector_store %arg7[%176, %c0_44], %175 {strides = array<i32>} : memref<8x32xf32, #tpu.memory_space<vmem>>, vector<1x32xf32>,
    %c5_i32 = arith.constant 5 : i32
    %178 = arith.index_cast %c5_i32 : i32 to index
    %c0_45 = arith.constant 0 : index
    %179 = vector.load %arg11[%178, %c0_45] : memref<8x96xf32, #tpu.memory_space<vmem>>, vector<1x96xf32>
    %180 = arith.truncf %175 : vector<1x32xf32> to vector<1x32xbf16>
    %cst_46 = arith.constant dense<0.000000e+00> : vector<1x96xf32>
    %181 = tpu.matmul %180, %10, %cst_46 {dimension_numbers = #tpu.dot_dimension_numbers<[1], [0], [0], [1], [0, 0, 1, 1], [], []>} : vector<1x32xbf16>, vector<32x96xbf16>, vector<1x96xf32> -> vector<1x96xf32>
    %182 = arith.addf %181, %11 : vector<1x96xf32>
    %183 = vector.extract_strided_slice %179 {offsets = [0, 0], sizes = [1, 32], strides = [1, 1]} : vector<1x96xf32> to vector<1x32xf32>
    %184 = vector.extract_strided_slice %182 {offsets = [0, 0], sizes = [1, 32], strides = [1, 1]} : vector<1x96xf32> to vector<1x32xf32>
    %185 = arith.addf %183, %184 : vector<1x32xf32>
    %186 = arith.negf %185 : vector<1x32xf32>
    %187 = math.exp %186 : vector<1x32xf32>
    %cst_47 = arith.constant 1.000000e+00 : f32
    %188 = vector.broadcast %cst_47 : f32 to vector<1x32xf32>
    %189 = arith.addf %188, %187 : vector<1x32xf32>
    %190 = arith.divf %188, %189 : vector<1x32xf32>
    %191 = vector.extract_strided_slice %179 {offsets = [0, 32], sizes = [1, 32], strides = [1, 1]} : vector<1x96xf32> to vector<1x32xf32>
    %192 = vector.extract_strided_slice %182 {offsets = [0, 32], sizes = [1, 32], strides = [1, 1]} : vector<1x96xf32> to vector<1x32xf32>
    %193 = arith.addf %191, %192 : vector<1x32xf32>
    %194 = arith.negf %193 : vector<1x32xf32>
    %195 = math.exp %194 : vector<1x32xf32>
    %cst_48 = arith.constant 1.000000e+00 : f32
    %196 = vector.broadcast %cst_48 : f32 to vector<1x32xf32>
    %197 = arith.addf %196, %195 : vector<1x32xf32>
    %198 = arith.divf %196, %197 : vector<1x32xf32>
    %199 = vector.extract_strided_slice %179 {offsets = [0, 64], sizes = [1, 32], strides = [1, 1]} : vector<1x96xf32> to vector<1x32xf32>
    %200 = vector.extract_strided_slice %182 {offsets = [0, 64], sizes = [1, 32], strides = [1, 1]} : vector<1x96xf32> to vector<1x32xf32>
    %201 = arith.mulf %190, %200 : vector<1x32xf32>
    %202 = arith.addf %199, %201 : vector<1x32xf32>
    %203 = math.tanh %202 : vector<1x32xf32>
    %cst_49 = arith.constant 1.000000e+00 : f32
    %204 = vector.broadcast %cst_49 : f32 to vector<1x32xf32>
    %205 = arith.subf %204, %198 : vector<1x32xf32>
    %206 = arith.mulf %205, %203 : vector<1x32xf32>
    %207 = arith.mulf %198, %175 : vector<1x32xf32>
    %208 = arith.addf %206, %207 : vector<1x32xf32>
    %209 = arith.index_cast %c5_i32 : i32 to index
    %c0_50 = arith.constant 0 : index
    %210 = vector.load %arg7[%209, %c0_50] : memref<8x32xf32, #tpu.memory_space<vmem>>, vector<1x32xf32>
    tpu.vector_store %arg7[%209, %c0_50], %208 {strides = array<i32>} : memref<8x32xf32, #tpu.memory_space<vmem>>, vector<1x32xf32>,
    %c6_i32 = arith.constant 6 : i32
    %211 = arith.index_cast %c6_i32 : i32 to index
    %c0_51 = arith.constant 0 : index
    %212 = vector.load %arg11[%211, %c0_51] : memref<8x96xf32, #tpu.memory_space<vmem>>, vector<1x96xf32>
    %213 = arith.truncf %208 : vector<1x32xf32> to vector<1x32xbf16>
    %cst_52 = arith.constant dense<0.000000e+00> : vector<1x96xf32>
    %214 = tpu.matmul %213, %10, %cst_52 {dimension_numbers = #tpu.dot_dimension_numbers<[1], [0], [0], [1], [0, 0, 1, 1], [], []>} : vector<1x32xbf16>, vector<32x96xbf16>, vector<1x96xf32> -> vector<1x96xf32>
    %215 = arith.addf %214, %11 : vector<1x96xf32>
    %216 = vector.extract_strided_slice %212 {offsets = [0, 0], sizes = [1, 32], strides = [1, 1]} : vector<1x96xf32> to vector<1x32xf32>
    %217 = vector.extract_strided_slice %215 {offsets = [0, 0], sizes = [1, 32], strides = [1, 1]} : vector<1x96xf32> to vector<1x32xf32>
    %218 = arith.addf %216, %217 : vector<1x32xf32>
    %219 = arith.negf %218 : vector<1x32xf32>
    %220 = math.exp %219 : vector<1x32xf32>
    %cst_53 = arith.constant 1.000000e+00 : f32
    %221 = vector.broadcast %cst_53 : f32 to vector<1x32xf32>
    %222 = arith.addf %221, %220 : vector<1x32xf32>
    %223 = arith.divf %221, %222 : vector<1x32xf32>
    %224 = vector.extract_strided_slice %212 {offsets = [0, 32], sizes = [1, 32], strides = [1, 1]} : vector<1x96xf32> to vector<1x32xf32>
    %225 = vector.extract_strided_slice %215 {offsets = [0, 32], sizes = [1, 32], strides = [1, 1]} : vector<1x96xf32> to vector<1x32xf32>
    %226 = arith.addf %224, %225 : vector<1x32xf32>
    %227 = arith.negf %226 : vector<1x32xf32>
    %228 = math.exp %227 : vector<1x32xf32>
    %cst_54 = arith.constant 1.000000e+00 : f32
    %229 = vector.broadcast %cst_54 : f32 to vector<1x32xf32>
    %230 = arith.addf %229, %228 : vector<1x32xf32>
    %231 = arith.divf %229, %230 : vector<1x32xf32>
    %232 = vector.extract_strided_slice %212 {offsets = [0, 64], sizes = [1, 32], strides = [1, 1]} : vector<1x96xf32> to vector<1x32xf32>
    %233 = vector.extract_strided_slice %215 {offsets = [0, 64], sizes = [1, 32], strides = [1, 1]} : vector<1x96xf32> to vector<1x32xf32>
    %234 = arith.mulf %223, %233 : vector<1x32xf32>
    %235 = arith.addf %232, %234 : vector<1x32xf32>
    %236 = math.tanh %235 : vector<1x32xf32>
    %cst_55 = arith.constant 1.000000e+00 : f32
    %237 = vector.broadcast %cst_55 : f32 to vector<1x32xf32>
    %238 = arith.subf %237, %231 : vector<1x32xf32>
    %239 = arith.mulf %238, %236 : vector<1x32xf32>
    %240 = arith.mulf %231, %208 : vector<1x32xf32>
    %241 = arith.addf %239, %240 : vector<1x32xf32>
    %242 = arith.index_cast %c6_i32 : i32 to index
    %c0_56 = arith.constant 0 : index
    %243 = vector.load %arg7[%242, %c0_56] : memref<8x32xf32, #tpu.memory_space<vmem>>, vector<1x32xf32>
    tpu.vector_store %arg7[%242, %c0_56], %241 {strides = array<i32>} : memref<8x32xf32, #tpu.memory_space<vmem>>, vector<1x32xf32>,
    %c7_i32 = arith.constant 7 : i32
    %244 = arith.index_cast %c7_i32 : i32 to index
    %c0_57 = arith.constant 0 : index
    %245 = vector.load %arg11[%244, %c0_57] : memref<8x96xf32, #tpu.memory_space<vmem>>, vector<1x96xf32>
    %246 = arith.truncf %241 : vector<1x32xf32> to vector<1x32xbf16>
    %cst_58 = arith.constant dense<0.000000e+00> : vector<1x96xf32>
    %247 = tpu.matmul %246, %10, %cst_58 {dimension_numbers = #tpu.dot_dimension_numbers<[1], [0], [0], [1], [0, 0, 1, 1], [], []>} : vector<1x32xbf16>, vector<32x96xbf16>, vector<1x96xf32> -> vector<1x96xf32>
    %248 = arith.addf %247, %11 : vector<1x96xf32>
    %249 = vector.extract_strided_slice %245 {offsets = [0, 0], sizes = [1, 32], strides = [1, 1]} : vector<1x96xf32> to vector<1x32xf32>
    %250 = vector.extract_strided_slice %248 {offsets = [0, 0], sizes = [1, 32], strides = [1, 1]} : vector<1x96xf32> to vector<1x32xf32>
    %251 = arith.addf %249, %250 : vector<1x32xf32>
    %252 = arith.negf %251 : vector<1x32xf32>
    %253 = math.exp %252 : vector<1x32xf32>
    %cst_59 = arith.constant 1.000000e+00 : f32
    %254 = vector.broadcast %cst_59 : f32 to vector<1x32xf32>
    %255 = arith.addf %254, %253 : vector<1x32xf32>
    %256 = arith.divf %254, %255 : vector<1x32xf32>
    %257 = vector.extract_strided_slice %245 {offsets = [0, 32], sizes = [1, 32], strides = [1, 1]} : vector<1x96xf32> to vector<1x32xf32>
    %258 = vector.extract_strided_slice %248 {offsets = [0, 32], sizes = [1, 32], strides = [1, 1]} : vector<1x96xf32> to vector<1x32xf32>
    %259 = arith.addf %257, %258 : vector<1x32xf32>
    %260 = arith.negf %259 : vector<1x32xf32>
    %261 = math.exp %260 : vector<1x32xf32>
    %cst_60 = arith.constant 1.000000e+00 : f32
    %262 = vector.broadcast %cst_60 : f32 to vector<1x32xf32>
    %263 = arith.addf %262, %261 : vector<1x32xf32>
    %264 = arith.divf %262, %263 : vector<1x32xf32>
    %265 = vector.extract_strided_slice %245 {offsets = [0, 64], sizes = [1, 32], strides = [1, 1]} : vector<1x96xf32> to vector<1x32xf32>
    %266 = vector.extract_strided_slice %248 {offsets = [0, 64], sizes = [1, 32], strides = [1, 1]} : vector<1x96xf32> to vector<1x32xf32>
    %267 = arith.mulf %256, %266 : vector<1x32xf32>
    %268 = arith.addf %265, %267 : vector<1x32xf32>
    %269 = math.tanh %268 : vector<1x32xf32>
    %cst_61 = arith.constant 1.000000e+00 : f32
    %270 = vector.broadcast %cst_61 : f32 to vector<1x32xf32>
    %271 = arith.subf %270, %264 : vector<1x32xf32>
    %272 = arith.mulf %271, %269 : vector<1x32xf32>
    %273 = arith.mulf %264, %241 : vector<1x32xf32>
    %274 = arith.addf %272, %273 : vector<1x32xf32>
    %275 = arith.index_cast %c7_i32 : i32 to index
    %c0_62 = arith.constant 0 : index
    %276 = vector.load %arg7[%275, %c0_62] : memref<8x32xf32, #tpu.memory_space<vmem>>, vector<1x32xf32>
    tpu.vector_store %arg7[%275, %c0_62], %274 {strides = array<i32>} : memref<8x32xf32, #tpu.memory_space<vmem>>, vector<1x32xf32>,
    %c8_i32 = arith.constant 8 : i32
    %c0_63 = arith.constant 0 : index
    %c0_64 = arith.constant 0 : index
    %277 = vector.load %arg12[%c0_63, %c0_64] : memref<1x32xf32, #tpu.memory_space<vmem>>, vector<1x32xf32>
    tpu.vector_store %arg12[%c0_63, %c0_64], %274 {strides = array<i32>} : memref<1x32xf32, #tpu.memory_space<vmem>>, vector<1x32xf32>,
    return
  }
  func.func @transform_0(%arg0: i32) -> (i32, i32) {
    %c0_i32 = arith.constant 0 : i32
    %c0_i32_0 = arith.constant 0 : i32
    return %arg0, %c0_i32 : i32, i32
  }
  func.func @transform_3(%arg0: i32) -> (i32, i32) {
    %c0_i32 = arith.constant 0 : i32
    %c0_i32_0 = arith.constant 0 : i32
    %c0_i32_1 = arith.constant 0 : i32
    return %c0_i32, %c0_i32_0 : i32, i32
  }
  func.func @transform_4(%arg0: i32) -> (i32, i32) {
    %c0_i32 = arith.constant 0 : i32
    %c0_i32_0 = arith.constant 0 : i32
    %c0_i32_1 = arith.constant 0 : i32
    return %c0_i32, %c0_i32_0 : i32, i32
  }
  func.func @transform_5(%arg0: i32) -> (i32, i32) {
    %c0_i32 = arith.constant 0 : i32
    %c0_i32_0 = arith.constant 0 : i32
    %c0_i32_1 = arith.constant 0 : i32
    return %c0_i32, %c0_i32_0 : i32, i32
  }
  func.func @transform_6(%arg0: i32) -> (i32, i32) {
    %c0_i32 = arith.constant 0 : i32
    %c0_i32_0 = arith.constant 0 : i32
    return %arg0, %c0_i32 : i32, i32
  }
}

</mosaic_0001>

<bundles_post_ra>
// kernel: tpu_custom_call.1
= control target key start
LH: loop header
LB: loop body
LE: loop exit
PB: predicated region body
PF: predicated region fallthrough
CT: control target
= control target key end

     0   :  { %11 = vsyncpa [#allocation8], 0  ;;  %s1329_s0 = inlined_call_operand.hbm [shape: bf16[8,32], index: 0, kind: input, shape index: {}]   ;;  %s1330_s1 = inlined_call_operand.hbm [shape: bf16[32,96], index: 1, kind: input, shape index: {}]   ;;  %s1331_s2 = inlined_call_operand.hbm [shape: bf16[32,96], index: 2, kind: input, shape index: {}]   ;;  %s1332_s3 = inlined_call_operand.vmem [shape: f32[1,96], index: 3, kind: input, shape index: {}]   ;;  %s1333_s4 = inlined_call_operand.vmem [shape: f32[1,96], index: 4, kind: input, shape index: {}]   ;;  %s1334_s5 = inlined_call_operand.vmem [shape: f32[1,32], index: 5, kind: input, shape index: {}]   ;;  %s1335_s6 = inlined_call_operand.hbm [shape: f32[8,32], index: 6, kind: output, shape index: {}]  }
   0x1   :  { %12 = vsyncpa [#allocation9], 0  ;;  %s1068_s21 = smov [#allocation7]   ;;  %s972_s25 = scalar_lea.hbm %s1329_s0, 64 }
   0x2   :  { %s19_s22 = sshll.u32 %s1068_s21, 4  ;;  %p973_p0 = scmp.ne.s32.totalorder %s1329_s0, %s972_s25  ;;  %s20_s22 = int_to_ptr.vmem [resolvable:$true] %s19_s22 }
   0x3   :  { %p976_p1 = scmp.lt.u32.totalorder %s972_s25, %s1329_s0 }
   0x5   :  { %p978_p2 = pnand %p976_p1, %p973_p0 }
   0x7   :  { %981 = shalt.err (!%p978_p2)
}
   0x8   :  { %s982_s30 = scalar_lea.vmem %s20_s22, 64  ;;  %p987_p4 = scmp.lt.s32.totalorder %s20_s22, %s20_s22 }
   0x9   :  { %p983_p3 = scmp.ne.s32.totalorder %s20_s22, %s982_s30  ;;  %p988_p5 = scmp.lt.s32.totalorder %s982_s30, %s982_s30 }
   0xb   :  { %p989_p6 = por %p988_p5, %p987_p4 }
   0xd   :  { %p990_p7 = pnand %p989_p6, %p983_p3 }
   0xf   :  { %993 = shalt.err (!%p990_p7)
}
  0x10   :  { %22 = dma.hbm_to_vmem [thread:$0]  %s1329_s0, 64, %s20_s22, [#allocation8]  }
  0x11   :  { %1060 = dma.done.wait [#allocation8], 64  }
  0x12   :  { %1061 = vsyncadd [#allocation8], 4294967232  ;;  %s1069_s9 = smov [#allocation2]   ;;  %s1070_s11 = smov [#allocation3]  }
  0x13   :  { %s44_s10 = sshll.u32 %s1069_s9, 4  ;;  %s56_s12 = sshll.u32 %s1070_s11, 4  ;;  %s45_s10 = int_to_ptr.vmem [resolvable:$true] %s44_s10  ;;  %s57_s12 = int_to_ptr.vmem [resolvable:$true] %s56_s12 }
  0x14   :  { %s994_s15 = scalar_lea.hbm %s1330_s1, 256 }
  0x15   :  { %p995_p8 = scmp.ne.s32.totalorder %s1330_s1, %s994_s15  ;;  %p998_p9 = scmp.lt.u32.totalorder %s994_s15, %s1330_s1 }
  0x17   :  { %p1000_p10 = pnand %p998_p9, %p995_p8 }
  0x19   :  { %1003 = shalt.err (!%p1000_p10)  }
  0x1a   :  { %s1004_s0 = scalar_lea.vmem %s45_s10, 256  ;;  %p1009_p12 = scmp.lt.s32.totalorder %s45_s10, %s45_s10 }
  0x1b   :  { %p1005_p11 = scmp.ne.s32.totalorder %s45_s10, %s1004_s0  ;;  %p1010_p13 = scmp.lt.s32.totalorder %s1004_s0, %s1004_s0 }
  0x1d   :  { %p1011_p0 = por %p1010_p13, %p1009_p12 }
  0x1f   :  { %p1012_p1 = pnand %p1011_p0, %p1005_p11 }
  0x21   :  { %1015 = shalt.err (!%p1012_p1)  }
  0x22   :  { %47 = dma.hbm_to_vmem [thread:$0]  %s1330_s1, 256, %s45_s10, [#allocation4] }
  0x23   :  { %s1016_s24 = scalar_lea.hbm %s1331_s2, 256 }
  0x24   :  { %p1017_p2 = scmp.ne.s32.totalorder %s1331_s2, %s1016_s24  ;;  %p1020_p3 = scmp.lt.u32.totalorder %s1016_s24, %s1331_s2 }
  0x26   :  { %p1022_p4 = pnand %p1020_p3, %p1017_p2 }
  0x28   :  { %1025 = shalt.err (!%p1022_p4)  }
  0x29   :  { %s1026_s29 = scalar_lea.vmem %s57_s12, 256  ;;  %p1031_p6 = scmp.lt.s32.totalorder %s57_s12, %s57_s12 }
  0x2a   :  { %p1027_p5 = scmp.ne.s32.totalorder %s57_s12, %s1026_s29  ;;  %p1032_p7 = scmp.lt.s32.totalorder %s1026_s29, %s1026_s29 }
  0x2c   :  { %p1033_p8 = por %p1032_p7, %p1031_p6 }
  0x2e   :  { %p1034_p9 = pnand %p1033_p8, %p1027_p5 }
  0x30   :  { %1037 = shalt.err (!%p1034_p9)  }
  0x31   :  { %59 = dma.hbm_to_vmem [thread:$0]  %s1331_s2, 256, %s57_s12, [#allocation4 + $0x1] }
  0x32   :  { %1062 = dma.done.wait [#allocation4], 256 }
  0x33   :  { %1063 = vsyncadd [#allocation4], 4294967040 }
  0x34   :  { %1064 = dma.done.wait [#allocation4 + $0x1], 256 }
  0x35   :  { %1065 = vsyncadd [#allocation4 + $0x1], 4294967040  ;;  %v1071_v0 = vmov 0.0   ;;  %vm1072_vm0 = vmmov 0   ;;  %vm67_vm1 = vcmask 253952   ;;  %v70_v1 = vld [vmem:[#allocation2] sm:$0xff]  ;;  %v199_v31 = vlaneseq }
  0x36   :  { %843 = vmatprep.subr.bf16.mxu0 %v1071_v0  ;;  %851 = vmatprep.subr.bf16.mxu1 %v1071_v0  ;;  %v1154_v2 = vld [vmem:[#allocation3] sm:$0xff]  ;;  %v66_v3 = vld [vmem:[%s1334_s5] sm:$0x1]  ;;  %v71_v4 = vld [vmem:[#allocation2 + $0x8] sm:$0xff]  ;;  %vm79_vm2 = vcmask 261120   ;;  %vm123_vm3 = vcmask 785408  }
  0x37   :  { %847 = vmatprep.mubr.msk.bf16.mxu0 %vm1072_vm0, %v1071_v0  ;;  %855 = vmatprep.mubr.msk.bf16.mxu1 %vm1072_vm0, %v1071_v0  ;;  %v1162_v5 = vld [vmem:[#allocation3 + $0x8] sm:$0xff]  ;;  %68 = vst.msk [vmem:[#allocation6] sm:$0x1] %vm67_vm1, %v66_v3  ;;  %v69_v6 = vld [vmem:[#allocation7] sm:$0xf]  ;;  %s1073_s11 = smov 64  }
  0x38   :  { %844 = vmatpush3.bf16.msra.mxu0 %v70_v1  ;;  %852 = vmatpush3.bf16.msra.mxu1 %v1154_v2  ;;  %v796_v9 = vld [vmem:[%s1332_s3] ss:$0 sm:$0xff]  ;;  %v200_v32 = vshrl.u32 %v199_v31, 7  ;;  %s1074_s3 = smov 96   ;;  %s1076_s12 = smov [#allocation10]  }
  0x39   :  { %845 = vmatprep.subr.bf16.mxu0 %v1071_v0  ;;  %853 = vmatprep.subr.bf16.mxu1 %v1071_v0  ;;  %v1188_v13 = vld [vmem:[%s1333_s4] sm:$0x1]  ;;  %s1075_s4 = smov 32   ;;  %s774_s13 = sshll.u32 %s1076_s12, 4  ;;  %s775_s13 = int_to_ptr.vmem [resolvable:$true] %s774_s13 }
  0x3a   :  { %v201_v33 = vsub.s32 0, %v200_v32  ;;  %s1038_s14 = scalar_lea.vmem %s775_s13, 128  ;;  %p1043_p11 = scmp.lt.s32.totalorder %s775_s13, %s775_s13 }
  0x3b   :  { %p1039_p10 = scmp.ne.s32.totalorder %s775_s13, %s1038_s14  ;;  %p1044_p12 = scmp.lt.s32.totalorder %s1038_s14, %s1038_s14 }
  0x3c   :  { %846 = vmatpush3.bf16.msra.mxu0 %v71_v4  ;;  %854 = vmatpush3.bf16.msra.mxu1 %v1162_v5 }
  0x3d   :  { %859 = vmatprep.subr.bf16.mxu0 %v1071_v0  ;;  %867 = vmatprep.subr.bf16.mxu1 %v1071_v0  ;;  %p1045_p13 = por %p1044_p12, %p1043_p11 }
  0x3e   :  { %v128_v7 = vld [vmem:[#allocation6] sm:$0x1] }
  0x3f   :  { %848 = vmatmul.mubr.msk.bf16.vlgmr.msra.gmra.mrb[0].mxu0 %vm79_vm2, %v69_v6  ;;  %v130_v8 = vpack.c.bf16 %v128_v7, %v128_v7  ;;  %v202_v35 = vrot.slane %v128_v7, %v201_v33  ;;  %p1046_p0 = pnand %p1045_p13, %p1039_p10 }
  0x40   :  { %860 = vmatpush3.bf16.msra.mxu0 %v1154_v2  ;;  %863 = vmatprep.mubr.msk.bf16.mxu0 %vm1072_vm0, %v1071_v0 }
  0x41   :  { %861 = vmatprep.subr.bf16.mxu0 %v1071_v0  ;;  %856 = vmatmul.mubr.msk.bf16.vlgmr.msra.gmra.mrb[0].mxu1 %vm79_vm2, %v130_v8 }
  0x42   :  { %868 = vmatpush3.bf16.msra.mxu1 %v1154_v2  ;;  %871 = vmatprep.mubr.msk.bf16.mxu1 %vm1072_vm0, %v1071_v0 }
  0x43   :  { %869 = vmatprep.subr.bf16.mxu1 %v1071_v0 }
  0x44   :  { %862 = vmatpush3.bf16.msra.mxu0 %v1162_v5 }
  0x45   :  { %875 = vmatprep.subr.bf16.mxu0 %v1071_v0 }
  0x46   :  { %870 = vmatpush3.bf16.msra.mxu1 %v1162_v5 }
  0x47   :  { %883 = vmatprep.subr.bf16.mxu1 %v1071_v0 }
 0x112   :  { %v117_v10 = vpop.f32.mrb[0].mxu0 }
 0x113   :  { %v118_v11 = vadd.f32 %v796_v9, %v117_v10  ;;  %v849_v12 = vpop.f32.mrb[1].mxu0 }
 0x114   :  { %v120_v14 = vpop.f32.mrb[2].mxu0  ;;  %v168_v16 = vpop.f32.mrb[0].mxu1 }
 0x115   :  { %124 = vst.msk [vmem:[#allocation5] sm:$0xff] %vm123_vm3, %v118_v11  ;;  %v850_v15 = vpop.f32.mrb[3].mxu0  ;;  %v169_v17 = vadd.f32 %v168_v16, %v1188_v13  ;;  %v857_v18 = vpop.f32.mrb[1].mxu1 }
 0x116   :  { %v171_v19 = vpop.f32.mrb[2].mxu1 }
 0x117   :  { %182 = vrot.lane.b32.xlu0 %v169_v17, %s1073_s11  ;;  %v858_v20 = vpop.f32.mrb[3].mxu1 }
 0x11c   :  { %v129_v21 = vld [vmem:[#allocation5] sm:$0x1]  ;;  %v214_v49 = vld [vmem:[#allocation5 + $0x1] sm:$0x1]  ;;  %v293_v11 = vld [vmem:[#allocation5 + $0x2] sm:$0x1] }
 0x11d   :  { %v174_v22 = vadd.f32 %v169_v17, %v129_v21 }
 0x11f   :  { %v799_v23 = vmul.f32 -1.442695, %v174_v22 }
 0x121   :  { %924 = vpow2.f32 %v799_v23 }
 0x12b   :  { %v925_v24 = vpop.eup %924 }
 0x12c   :  { %v178_v25 = vadd.f32 1.0, %v925_v24 }
 0x12e   :  { %926 = vrcp.f32 %v178_v25 }
 0x138   :  { %v927_v26 = vpop.eup %926 }
 0x139   :  { %v192_v37 = vsub.f32 1.0, %v927_v26 }
 0x189   :  { %v183_v27 = vpop.permute.xlu0 %182 }
 0x18a   :  { %v185_v28 = vmul.f32 %v927_v26, %v183_v27 }
 0x18c   :  { %187 = vrot.lane.b32.xlu0 %v185_v28, %s1073_s11 }
 0x1fe   :  { %v188_v29 = vpop.permute.xlu0 %187 }
 0x1ff   :  { %v190_v30 = vadd.f32 %v188_v29, %v129_v21 }
 0x201   :  { %928 = vtanh.f32 %v190_v30 }
 0x20b   :  { %v929_v34 = vpop.eup %928 }
 0x20c   :  { %194 = vrot.lane.b32.xlu1 %v929_v34, %s1074_s3 }
 0x210   :  { %203 = vrot.lane.b32.xlu1 %v202_v35, %s1075_s4  ;;  %v372_v35 = vld [vmem:[#allocation5 + $0x3] sm:$0x1] }
 0x27e   :  { %v195_v36 = vpop.permute.xlu1 %194 }
 0x27f   :  { %v197_v39 = vmul.f32 %v195_v36, %v192_v37 }
 0x282   :  { %v204_v38 = vpop.permute.xlu1 %203 }
 0x283   :  { %v206_v40 = vmul.f32 %v927_v26, %v204_v38 }
 0x285   :  { %v1194_v41 = vadd.f32 %v206_v40, %v197_v39 }
 0x287   :  { %v215_v42 = vpack.c.bf16 %v1194_v41, %v1194_v41 }
 0x289   :  { %217 = vrot.lane.b32.xlu0 %v215_v42, %s1074_s3 }
 0x2fb   :  { %v218_v43 = vpop.permute.xlu0 %217 }
 0x2fc   :  { %864 = vmatmul.mubr.msk.bf16.vlgmr.msra.gmra.mrb[4].mxu0 %vm79_vm2, %v218_v43 }
 0x2fd   :  { %876 = vmatpush3.bf16.msra.mxu0 %v1154_v2  ;;  %879 = vmatprep.mubr.msk.bf16.mxu0 %vm1072_vm0, %v1071_v0 }
 0x2fe   :  { %877 = vmatprep.subr.bf16.mxu0 %v1071_v0 }
 0x301   :  { %878 = vmatpush3.bf16.msra.mxu0 %v1162_v5 }
 0x302   :  { %891 = vmatprep.subr.bf16.mxu0 %v1071_v0 }
 0x3cf   :  { %v256_v44 = vpop.f32.mrb[4].mxu0 }
 0x3d0   :  { %v257_v45 = vadd.f32 %v256_v44, %v1188_v13  ;;  %v865_v46 = vpop.f32.mrb[5].mxu0 }
 0x3d1   :  { %v259_v47 = vpop.f32.mrb[6].mxu0 }
 0x3d2   :  { %270 = vrot.lane.b32.xlu1 %v257_v45, %s1073_s11  ;;  %v866_v48 = vpop.f32.mrb[7].mxu0  ;;  %v262_v50 = vadd.f32 %v257_v45, %v214_v49 }
 0x3d4   :  { %v801_v51 = vmul.f32 -1.442695, %v262_v50 }
 0x3d6   :  { %930 = vpow2.f32 %v801_v51 }
 0x3e0   :  { %v931_v52 = vpop.eup %930 }
 0x3e1   :  { %v266_v53 = vadd.f32 1.0, %v931_v52 }
 0x3e3   :  { %932 = vrcp.f32 %v266_v53 }
 0x3ed   :  { %v933_v54 = vpop.eup %932 }
 0x3ee   :  { %v280_v60 = vsub.f32 1.0, %v933_v54  ;;  %v286_v62 = vmul.f32 %v933_v54, %v1194_v41 }
 0x444   :  { %v271_v55 = vpop.permute.xlu1 %270 }
 0x445   :  { %v273_v56 = vmul.f32 %v933_v54, %v271_v55 }
 0x447   :  { %275 = vrot.lane.b32.xlu0 %v273_v56, %s1073_s11 }
 0x4b9   :  { %v276_v57 = vpop.permute.xlu0 %275 }
 0x4ba   :  { %v278_v58 = vadd.f32 %v276_v57, %v214_v49 }
 0x4bc   :  { %934 = vtanh.f32 %v278_v58 }
 0x4c6   :  { %v935_v59 = vpop.eup %934 }
 0x4c7   :  { %282 = vrot.lane.b32.xlu1 %v935_v59, %s1074_s3  ;;  %v451_v59 = vld [vmem:[#allocation5 + $0x4] sm:$0x1] }
 0x539   :  { %v283_v61 = vpop.permute.xlu1 %282 }
 0x53a   :  { %v285_v63 = vmul.f32 %v283_v61, %v280_v60 }
 0x53c   :  { %v1211_v1 = vadd.f32 %v286_v62, %v285_v63 }
 0x53e   :  { %v294_v3 = vpack.c.bf16 %v1211_v1, %v1211_v1 }
 0x540   :  { %296 = vrot.lane.b32.xlu0 %v294_v3, %s1074_s3 }
 0x5b2   :  { %v297_v4 = vpop.permute.xlu0 %296 }
 0x5b3   :  { %872 = vmatmul.mubr.msk.bf16.vlgmr.msra.gmra.mrb[4].mxu1 %vm79_vm2, %v297_v4 }
 0x5b4   :  { %884 = vmatpush3.bf16.msra.mxu1 %v1154_v2  ;;  %887 = vmatprep.mubr.msk.bf16.mxu1 %vm1072_vm0, %v1071_v0 }
 0x5b5   :  { %885 = vmatprep.subr.bf16.mxu1 %v1071_v0 }
 0x5b8   :  { %886 = vmatpush3.bf16.msra.mxu1 %v1162_v5 }
 0x5b9   :  { %899 = vmatprep.subr.bf16.mxu1 %v1071_v0 }
 0x686   :  { %v335_v6 = vpop.f32.mrb[4].mxu1 }
 0x687   :  { %v336_v7 = vadd.f32 %v335_v6, %v1188_v13  ;;  %v873_v8 = vpop.f32.mrb[5].mxu1 }
 0x688   :  { %v338_v9 = vpop.f32.mrb[6].mxu1 }
 0x689   :  { %349 = vrot.lane.b32.xlu1 %v336_v7, %s1073_s11  ;;  %v874_v10 = vpop.f32.mrb[7].mxu1  ;;  %v341_v12 = vadd.f32 %v336_v7, %v293_v11 }
 0x68b   :  { %v803_v14 = vmul.f32 -1.442695, %v341_v12 }
 0x68d   :  { %936 = vpow2.f32 %v803_v14 }
 0x697   :  { %v937_v15 = vpop.eup %936 }
 0x698   :  { %v345_v16 = vadd.f32 1.0, %v937_v15 }
 0x69a   :  { %938 = vrcp.f32 %v345_v16 }
 0x6a4   :  { %v939_v17 = vpop.eup %938 }
 0x6a5   :  { %v359_v23 = vsub.f32 1.0, %v939_v17  ;;  %v365_v25 = vmul.f32 %v939_v17, %v1211_v1 }
 0x6fb   :  { %v350_v18 = vpop.permute.xlu1 %349 }
 0x6fc   :  { %v352_v19 = vmul.f32 %v939_v17, %v350_v18 }
 0x6fe   :  { %354 = vrot.lane.b32.xlu0 %v352_v19, %s1073_s11 }
 0x770   :  { %v355_v20 = vpop.permute.xlu0 %354 }
 0x771   :  { %v357_v21 = vadd.f32 %v355_v20, %v293_v11 }
 0x773   :  { %940 = vtanh.f32 %v357_v21 }
 0x77d   :  { %v941_v22 = vpop.eup %940 }
 0x77e   :  { %361 = vrot.lane.b32.xlu1 %v941_v22, %s1074_s3 }
 0x7f0   :  { %v362_v24 = vpop.permute.xlu1 %361 }
 0x7f1   :  { %v364_v26 = vmul.f32 %v362_v24, %v359_v23  ;;  %v530_v23 = vld [vmem:[#allocation5 + $0x5] sm:$0x1] }
 0x7f3   :  { %v1228_v27 = vadd.f32 %v365_v25, %v364_v26 }
 0x7f5   :  { %v373_v28 = vpack.c.bf16 %v1228_v27, %v1228_v27 }
 0x7f7   :  { %375 = vrot.lane.b32.xlu0 %v373_v28, %s1074_s3 }
 0x869   :  { %v376_v29 = vpop.permute.xlu0 %375 }
 0x86a   :  { %880 = vmatmul.mubr.msk.bf16.vlgmr.msra.gmra.mrb[8].mxu0 %vm79_vm2, %v376_v29 }
 0x86b   :  { %892 = vmatpush3.bf16.msra.mxu0 %v1154_v2  ;;  %895 = vmatprep.mubr.msk.bf16.mxu0 %vm1072_vm0, %v1071_v0 }
 0x86c   :  { %893 = vmatprep.subr.bf16.mxu0 %v1071_v0 }
 0x86f   :  { %894 = vmatpush3.bf16.msra.mxu0 %v1162_v5 }
 0x870   :  { %907 = vmatprep.subr.bf16.mxu0 %v1071_v0 }
 0x93d   :  { %v414_v30 = vpop.f32.mrb[8].mxu0 }
 0x93e   :  { %v415_v31 = vadd.f32 %v414_v30, %v1188_v13  ;;  %v881_v32 = vpop.f32.mrb[9].mxu0 }
 0x93f   :  { %v417_v33 = vpop.f32.mrb[10].mxu0 }
 0x940   :  { %428 = vrot.lane.b32.xlu1 %v415_v31, %s1073_s11  ;;  %v882_v34 = vpop.f32.mrb[11].mxu0  ;;  %v420_v36 = vadd.f32 %v415_v31, %v372_v35 }
 0x942   :  { %v805_v37 = vmul.f32 -1.442695, %v420_v36 }
 0x944   :  { %942 = vpow2.f32 %v805_v37 }
 0x94e   :  { %v943_v38 = vpop.eup %942 }
 0x94f   :  { %v424_v39 = vadd.f32 1.0, %v943_v38 }
 0x951   :  { %944 = vrcp.f32 %v424_v39 }
 0x95b   :  { %v945_v40 = vpop.eup %944 }
 0x95c   :  { %v438_v47 = vsub.f32 1.0, %v945_v40  ;;  %v444_v49 = vmul.f32 %v945_v40, %v1228_v27 }
 0x9b2   :  { %v429_v42 = vpop.permute.xlu1 %428 }
 0x9b3   :  { %v431_v43 = vmul.f32 %v945_v40, %v429_v42 }
 0x9b5   :  { %433 = vrot.lane.b32.xlu0 %v431_v43, %s1073_s11 }
 0xa27   :  { %v434_v44 = vpop.permute.xlu0 %433 }
 0xa28   :  { %v436_v45 = vadd.f32 %v434_v44, %v372_v35 }
 0xa2a   :  { %946 = vtanh.f32 %v436_v45  ;;  %v609_v45 = vld [vmem:[#allocation5 + $0x6] sm:$0x1] }
 0xa34   :  { %v947_v46 = vpop.eup %946 }
 0xa35   :  { %440 = vrot.lane.b32.xlu1 %v947_v46, %s1074_s3 }
 0xaa7   :  { %v441_v48 = vpop.permute.xlu1 %440 }
 0xaa8   :  { %v443_v50 = vmul.f32 %v441_v48, %v438_v47 }
 0xaaa   :  { %v1245_v51 = vadd.f32 %v444_v49, %v443_v50 }
 0xaac   :  { %v452_v52 = vpack.c.bf16 %v1245_v51, %v1245_v51 }
 0xaae   :  { %454 = vrot.lane.b32.xlu0 %v452_v52, %s1074_s3 }
 0xb20   :  { %v455_v53 = vpop.permute.xlu0 %454 }
 0xb21   :  { %888 = vmatmul.mubr.msk.bf16.vlgmr.msra.gmra.mrb[8].mxu1 %vm79_vm2, %v455_v53 }
 0xb22   :  { %900 = vmatpush3.bf16.msra.mxu1 %v1154_v2  ;;  %903 = vmatprep.mubr.msk.bf16.mxu1 %vm1072_vm0, %v1071_v0 }
 0xb23   :  { %901 = vmatprep.subr.bf16.mxu1 %v1071_v0 }
 0xb26   :  { %902 = vmatpush3.bf16.msra.mxu1 %v1162_v5 }
 0xbf4   :  { %v493_v54 = vpop.f32.mrb[8].mxu1 }
 0xbf5   :  { %v494_v55 = vadd.f32 %v493_v54, %v1188_v13  ;;  %v889_v56 = vpop.f32.mrb[9].mxu1 }
 0xbf6   :  { %v496_v57 = vpop.f32.mrb[10].mxu1 }
 0xbf7   :  { %507 = vrot.lane.b32.xlu1 %v494_v55, %s1073_s11  ;;  %v890_v58 = vpop.f32.mrb[11].mxu1  ;;  %v499_v60 = vadd.f32 %v494_v55, %v451_v59 }
 0xbf9   :  { %v807_v61 = vmul.f32 -1.442695, %v499_v60 }
 0xbfb   :  { %948 = vpow2.f32 %v807_v61 }
 0xc05   :  { %v949_v62 = vpop.eup %948 }
 0xc06   :  { %v503_v63 = vadd.f32 1.0, %v949_v62 }
 0xc08   :  { %950 = vrcp.f32 %v503_v63 }
 0xc12   :  { %v951_v3 = vpop.eup %950 }
 0xc13   :  { %v517_v10 = vsub.f32 1.0, %v951_v3  ;;  %v523_v12 = vmul.f32 %v951_v3, %v1245_v51 }
 0xc69   :  { %v508_v4 = vpop.permute.xlu1 %507 }
 0xc6a   :  { %v510_v6 = vmul.f32 %v951_v3, %v508_v4 }
 0xc6c   :  { %512 = vrot.lane.b32.xlu0 %v510_v6, %s1073_s11 }
 0xcde   :  { %v513_v7 = vpop.permute.xlu0 %512 }
 0xcdf   :  { %v515_v8 = vadd.f32 %v513_v7, %v451_v59 }
 0xce1   :  { %952 = vtanh.f32 %v515_v8 }
 0xceb   :  { %v953_v9 = vpop.eup %952 }
 0xcec   :  { %519 = vrot.lane.b32.xlu1 %v953_v9, %s1074_s3  ;;  %v688_v9 = vld [vmem:[#allocation5 + $0x7] sm:$0x1] }
 0xd5e   :  { %v520_v11 = vpop.permute.xlu1 %519 }
 0xd5f   :  { %v522_v14 = vmul.f32 %v520_v11, %v517_v10 }
 0xd61   :  { %v1261_v15 = vadd.f32 %v523_v12, %v522_v14 }
 0xd63   :  { %v531_v16 = vpack.c.bf16 %v1261_v15, %v1261_v15 }
 0xd65   :  { %533 = vrot.lane.b32.xlu0 %v531_v16, %s1074_s3 }
 0xdd7   :  { %v534_v17 = vpop.permute.xlu0 %533 }
 0xdd8   :  { %896 = vmatmul.mubr.msk.bf16.vlgmr.msra.gmra.mrb[12].mxu0 %vm79_vm2, %v534_v17 }
 0xdd9   :  { %908 = vmatpush3.bf16.msra.mxu0 %v1154_v2  ;;  %911 = vmatprep.mubr.msk.bf16.mxu0 %vm1072_vm0, %v1071_v0 }
 0xdda   :  { %909 = vmatprep.subr.bf16.mxu0 %v1071_v0 }
 0xddd   :  { %910 = vmatpush3.bf16.msra.mxu0 %v1162_v5 }
 0xeab   :  { %v572_v18 = vpop.f32.mrb[12].mxu0 }
 0xeac   :  { %v573_v19 = vadd.f32 %v572_v18, %v1188_v13  ;;  %v897_v20 = vpop.f32.mrb[13].mxu0 }
 0xead   :  { %v575_v21 = vpop.f32.mrb[14].mxu0 }
 0xeae   :  { %586 = vrot.lane.b32.xlu1 %v573_v19, %s1073_s11  ;;  %v898_v22 = vpop.f32.mrb[15].mxu0  ;;  %v578_v24 = vadd.f32 %v573_v19, %v530_v23 }
 0xeb0   :  { %v809_v25 = vmul.f32 -1.442695, %v578_v24 }
 0xeb2   :  { %954 = vpow2.f32 %v809_v25 }
 0xebc   :  { %v955_v2 = vpop.eup %954 }
 0xebd   :  { %v582_v26 = vadd.f32 1.0, %v955_v2 }
 0xebf   :  { %956 = vrcp.f32 %v582_v26 }
 0xec9   :  { %v957_v28 = vpop.eup %956 }
 0xeca   :  { %v596_v32 = vsub.f32 1.0, %v957_v28  ;;  %v602_v34 = vmul.f32 %v957_v28, %v1261_v15 }
 0xf20   :  { %v587_v29 = vpop.permute.xlu1 %586 }
 0xf21   :  { %v589_v0 = vmul.f32 %v957_v28, %v587_v29 }
 0xf23   :  { %591 = vrot.lane.b32.xlu0 %v589_v0, %s1073_s11 }
 0xf95   :  { %v592_v5 = vpop.permute.xlu0 %591 }
 0xf96   :  { %v594_v30 = vadd.f32 %v592_v5, %v530_v23 }
 0xf98   :  { %958 = vtanh.f32 %v594_v30 }
 0xfa2   :  { %v959_v31 = vpop.eup %958 }
 0xfa3   :  { %598 = vrot.lane.b32.xlu1 %v959_v31, %s1074_s3 }
0x1015   :  { %v599_v33 = vpop.permute.xlu1 %598 }
0x1016   :  { %v601_v35 = vmul.f32 %v599_v33, %v596_v32 }
0x1018   :  { %v1277_v36 = vadd.f32 %v602_v34, %v601_v35 }
0x101a   :  { %v610_v37 = vpack.c.bf16 %v1277_v36, %v1277_v36 }
0x101c   :  { %612 = vrot.lane.b32.xlu0 %v610_v37, %s1074_s3 }
0x108e   :  { %v613_v38 = vpop.permute.xlu0 %612 }
0x108f   :  { %904 = vmatmul.mubr.msk.bf16.vlgmr.msra.gmra.mrb[12].mxu1 %vm79_vm2, %v613_v38 }
0x1162   :  { %v651_v39 = vpop.f32.mrb[12].mxu1 }
0x1163   :  { %v652_v40 = vadd.f32 %v651_v39, %v1188_v13  ;;  %v905_v42 = vpop.f32.mrb[13].mxu1 }
0x1164   :  { %v654_v43 = vpop.f32.mrb[14].mxu1 }
0x1165   :  { %665 = vrot.lane.b32.xlu1 %v652_v40, %s1073_s11  ;;  %v906_v44 = vpop.f32.mrb[15].mxu1  ;;  %v657_v46 = vadd.f32 %v652_v40, %v609_v45 }
0x1167   :  { %v811_v47 = vmul.f32 -1.442695, %v657_v46 }
0x1169   :  { %960 = vpow2.f32 %v811_v47 }
0x1173   :  { %v961_v48 = vpop.eup %960 }
0x1174   :  { %v661_v49 = vadd.f32 1.0, %v961_v48 }
0x1176   :  { %962 = vrcp.f32 %v661_v49 }
0x1180   :  { %v963_v50 = vpop.eup %962 }
0x1181   :  { %v675_v57 = vsub.f32 1.0, %v963_v50  ;;  %v681_v59 = vmul.f32 %v963_v50, %v1277_v36 }
0x11d7   :  { %v666_v52 = vpop.permute.xlu1 %665 }
0x11d8   :  { %v668_v53 = vmul.f32 %v963_v50, %v666_v52 }
0x11da   :  { %670 = vrot.lane.b32.xlu0 %v668_v53, %s1073_s11 }
0x124c   :  { %v671_v54 = vpop.permute.xlu0 %670 }
0x124d   :  { %v673_v55 = vadd.f32 %v671_v54, %v609_v45 }
0x124f   :  { %964 = vtanh.f32 %v673_v55 }
0x1259   :  { %v965_v56 = vpop.eup %964 }
0x125a   :  { %677 = vrot.lane.b32.xlu1 %v965_v56, %s1074_s3 }
0x12cc   :  { %v678_v58 = vpop.permute.xlu1 %677 }
0x12cd   :  { %v680_v60 = vmul.f32 %v678_v58, %v675_v57 }
0x12cf   :  { %v682_v61 = vadd.f32 %v681_v59, %v680_v60 }
0x12d1   :  { %v689_v62 = vpack.c.bf16 %v682_v61, %v682_v61 }
0x12d3   :  { %691 = vrot.lane.b32.xlu0 %v689_v62, %s1074_s3 }
0x1345   :  { %v692_v63 = vpop.permute.xlu0 %691 }
0x1346   :  { %912 = vmatmul.mubr.msk.bf16.vlgmr.msra.gmra.mrb[16].mxu0 %vm79_vm2, %v692_v63 }
0x1419   :  { %v730_v3 = vpop.f32.mrb[16].mxu0 }
0x141a   :  { %v731_v4 = vadd.f32 %v730_v3, %v1188_v13  ;;  %v913_v6 = vpop.f32.mrb[17].mxu0 }
0x141b   :  { %v733_v7 = vpop.f32.mrb[18].mxu0 }
0x141c   :  { %744 = vrot.lane.b32.xlu1 %v731_v4, %s1073_s11  ;;  %v914_v8 = vpop.f32.mrb[19].mxu0  ;;  %v736_v10 = vadd.f32 %v731_v4, %v688_v9 }
0x141e   :  { %v813_v11 = vmul.f32 -1.442695, %v736_v10 }
0x1420   :  { %966 = vpow2.f32 %v813_v11 }
0x142a   :  { %v967_v12 = vpop.eup %966 }
0x142b   :  { %v740_v14 = vadd.f32 1.0, %v967_v12 }
0x142d   :  { %968 = vrcp.f32 %v740_v14 }
0x1437   :  { %v969_v16 = vpop.eup %968 }
0x1438   :  { %v760_v24 = vmul.f32 %v969_v16, %v682_v61 }
0x148e   :  { %v745_v17 = vpop.permute.xlu1 %744 }
0x148f   :  { %v747_v18 = vmul.f32 %v969_v16, %v745_v17 }
0x1491   :  { %749 = vrot.lane.b32.xlu0 %v747_v18, %s1073_s11 }
0x1495   :  { %209 = vrot.lane.b32.xlu0 %v1194_v41, %s1074_s3 }
0x1499   :  { %368 = vrot.lane.b32.xlu0 %v1228_v27, %s1074_s3  ;;  %v754_v27 = vsub.f32 1.0, %v969_v16 }
0x149d   :  { %526 = vrot.lane.b32.xlu0 %v1261_v15, %s1074_s3 }
0x14a1   :  { %684 = vrot.lane.b32.xlu0 %v682_v61, %s1074_s3 }
0x1503   :  { %v750_v13 = vpop.permute.xlu0 %749 }
0x1504   :  { %v752_v19 = vadd.f32 %v750_v13, %v688_v9 }
0x1506   :  { %970 = vtanh.f32 %v752_v19 }
0x1507   :  { %v210_v20 = vpop.permute.xlu0 %209 }
0x1508   :  { %213 = vst.msk [vmem:[#allocation10] sm:$0x1] %vm67_vm1, %v210_v20 }
0x150b   :  { %v369_v21 = vpop.permute.xlu0 %368 }
0x150c   :  { %371 = vst.msk [vmem:[#allocation10 + $0x2] sm:$0x1] %vm67_vm1, %v369_v21 }
0x150f   :  { %v527_v22 = vpop.permute.xlu0 %526 }
0x1510   :  { %v971_v23 = vpop.eup %970  ;;  %529 = vst.msk [vmem:[#allocation10 + $0x4] sm:$0x1] %vm67_vm1, %v527_v22 }
0x1511   :  { %756 = vrot.lane.b32.xlu1 %v971_v23, %s1074_s3 }
0x1513   :  { %v685_v41 = vpop.permute.xlu0 %684 }
0x1514   :  { %687 = vst.msk [vmem:[#allocation10 + $0x6] sm:$0x1] %vm67_vm1, %v685_v41 }
0x1515   :  { %289 = vrot.lane.b32.xlu1 %v1211_v1, %s1074_s3 }
0x1519   :  { %447 = vrot.lane.b32.xlu1 %v1245_v51, %s1074_s3 }
0x151d   :  { %605 = vrot.lane.b32.xlu1 %v1277_v36, %s1074_s3 }
0x1583   :  { %v757_v15 = vpop.permute.xlu1 %756 }
0x1584   :  { %v759_v25 = vmul.f32 %v757_v15, %v754_v27 }
0x1586   :  { %v761_v2 = vadd.f32 %v760_v24, %v759_v25 }
0x1587   :  { %v290_v26 = vpop.permute.xlu1 %289 }
0x1588   :  { %292 = vst.msk [vmem:[#allocation10 + $0x1] sm:$0x1] %vm67_vm1, %v290_v26  ;;  %763 = vrot.lane.b32.xlu1 %v761_v2, %s1074_s3 }
0x158b   :  { %v448_v28 = vpop.permute.xlu1 %447 }
0x158c   :  { %450 = vst.msk [vmem:[#allocation10 + $0x3] sm:$0x1] %vm67_vm1, %v448_v28 }
0x158f   :  { %v606_v1 = vpop.permute.xlu1 %605 }
0x1590   :  { %608 = vst.msk [vmem:[#allocation10 + $0x5] sm:$0x1] %vm67_vm1, %v606_v1 }
0x15fa   :  { %v764_v51 = vpop.permute.xlu1 %763 }
0x15fb   :  { %766 = vst.msk [vmem:[#allocation10 + $0x7] sm:$0x1] %vm67_vm1, %v764_v51  ;;  %767 = vst.msk [vmem:[#allocation6] sm:$0x1] %vm67_vm1, %v764_v51 }
0x15fc   :  { %1049 = shalt.err (!%p1046_p0)
}
0x15fd   :  { %s1050_s17 = scalar_lea.hbm %s1335_s6, 128 }
0x15fe   :  { %p1051_p1 = scmp.ne.s32.totalorder %s1335_s6, %s1050_s17  ;;  %p1054_p2 = scmp.lt.u32.totalorder %s1050_s17, %s1335_s6 }
0x1600   :  { %p1056_p3 = pnand %p1054_p2, %p1051_p1 }
0x1602   :  { %1059 = shalt.err (!%p1056_p3)
}
0x1603   :  { %777 = dma.vmem_to_hbm [thread:$0]  %s775_s13, 128, %s1335_s6, [#allocation9]  }
0x1604   :  { %1066 = dma.done.wait [#allocation9], 128  }
0x1605   :  { %1067 = vsyncadd [#allocation9], 4294967168 }
0x1606   :  { %781 = vsyncpa [#allocation8], 1 }
0x1607   :  { %782 = vsyncpa [#allocation9], 1 }
0x1608   :  { %783 = vsyncmov [#allocation4] }
0x160b   :  { %s784_s23 = vpop.sfrf %783 }
0x160c   :  { %p814_p4 = scmp.ne.s32.totalorder %s784_s23, 0 }
0x160e   :  { %788 = shalt.err (%p814_p4)  }
0x160f   :  { %790 = vsyncmov [#allocation4 + $0x1] }
0x1612   :  { %s791_s24 = vpop.sfrf %790 }
0x1613   :  { %p815_p5 = scmp.ne.s32.totalorder %s791_s24, 0 }
0x1615   :  { %795 = shalt.err (%p815_p5)  }

</bundles_post_ra>
